<compile_context>
chip_gen: v6e
topology: v6e:2x2x1
jax: 0.10.0
libtpu: 0.0.40
codegen_flags: <defaults>
</compile_context>

<pallas_src>
import jax
import jax.numpy as jnp
from jax.experimental import pallas as pl
from jax.experimental.pallas import tpu as pltpu


# ---------------------------------------------------------------------------
# helpers
# ---------------------------------------------------------------------------

def _spec(shape, index_map, *, single_buffer=False):
    """BlockSpec; resident (constant-index) operands get Buffered(1)."""
    if single_buffer:
        try:
            return pl.BlockSpec(shape, index_map, pipeline_mode=pl.Buffered(1))
        except (TypeError, AttributeError):
            pass  # older jax without pipeline_mode: fall back to default
    return pl.BlockSpec(shape, index_map)


def _num_tensorcores():
    """Best-effort TensorCore count per chip (2 on v7x, else 1)."""
    try:
        d = jax.devices()[0]
        nc = getattr(d, "num_cores", None)
        if nc:
            return max(1, min(2, int(nc)))
        kind = str(getattr(d, "device_kind", "")).lower()
        if "v7" in kind:
            return 2
    except Exception:
        pass
    return 1


def _vmem_limit(estimate_bytes):
    est = int(estimate_bytes) * 2 + (2 << 20)
    return max(8 << 20, min(est, 48 << 20))


def _pick_lane_tile(M, ncores):
    """Lane (last-dim) tile over tokens for the transposed path."""
    if M % 128 != 0:
        return M                       # full-dim block (always legal)
    target = max(128, min(512, M // max(1, ncores)))
    t = (target // 128) * 128
    while t > 128 and M % t != 0:
        t -= 128
    return t if M % t == 0 else M


def _pick_row_tile(M, ncores):
    """Sublane (row) tile over tokens for the row-major path."""
    if M % 8 != 0:
        return M
    target = max(8, min(512, pl.cdiv(M, max(1, ncores))))
    t = (target // 8) * 8
    while t > 8 and M % t != 0:
        t -= 8
    return t if M % t == 0 else M


def _pick_e_tile(E):
    """Hidden-dim (reduction) tile for the row-major path."""
    if E % 128 != 0:
        return E
    t = min(512, E)
    while t > 128 and E % t != 0:
        t -= 128
    return t if E % t == 0 else E


# ---------------------------------------------------------------------------
# Kernel A: tokens-on-lanes (transposed) layout — used when dim < 128 so the
# output's lane dim is the token tile (>= 128) instead of dim.
#   xT:(D,tn) bf16, w1T:(E,D) bf16, b1:(E,1) f32, w2T:(D,E) bf16, b2:(D,1) f32
#   -> oT:(D,tn) f32
# ---------------------------------------------------------------------------

def _mlp_kernel_tokens_on_lanes(xT_ref, w1T_ref, b1_ref, w2T_ref, b2_ref, oT_ref):
    # fc1: h^T = W1^T @ x^T + b1                  (E, tn)
    h = jnp.dot(w1T_ref[...], xT_ref[...],
                preferred_element_type=jnp.float32) + b1_ref[...]
    # drop1: identity (drop_rate = 0.0); activation is NOT applied in forward()
    # fc2: y^T = W2^T @ h^T + b2                  (D, tn)
    y = jnp.dot(w2T_ref[...], h.astype(w2T_ref.dtype),
                preferred_element_type=jnp.float32) + b2_ref[...]
    # drop2: identity
    oT_ref[...] = y.astype(oT_ref.dtype)
    # TODO(synk): training-mode dropout (drop_rate > 0) is not implemented
    # (would need pltpu.prng_seed + pltpu.stateful_bernoulli); the module
    # default drop_rate=0.0 makes both dropouts the identity.


def _make_call_tokens_on_lanes(M, D, E, tn):
    est = (2 * E * D) * 2 + (E + D) * 4           # resident weights + biases
    est += 2 * (D * tn * 2) + 2 * (D * tn * 4)    # double-buffered xT / oT tiles
    est += E * tn * 4                             # h intermediate
    return pl.pallas_call(
        _mlp_kernel_tokens_on_lanes,
        out_shape=jax.ShapeDtypeStruct((D, M), jnp.float32),
        grid_spec=pltpu.PrefetchScalarGridSpec(
            num_scalar_prefetch=0,
            grid=(M // tn,),
            in_specs=[
                _spec((D, tn), lambda i: (0, i)),                      # x^T tile
                _spec((E, D), lambda i: (0, 0), single_buffer=True),   # W1^T
                _spec((E, 1), lambda i: (0, 0), single_buffer=True),   # b1
                _spec((D, E), lambda i: (0, 0), single_buffer=True),   # W2^T
                _spec((D, 1), lambda i: (0, 0), single_buffer=True),   # b2
            ],
            out_specs=pl.BlockSpec((D, tn), lambda i: (0, i)),
        ),
        compiler_params=pltpu.CompilerParams(
            dimension_semantics=("parallel",),
            vmem_limit_bytes=_vmem_limit(est),
        ),
    )


# ---------------------------------------------------------------------------
# Kernel B: row-major layout with an E-reduction axis — used when dim >= 128.
# Grid = (M/tm rows "parallel", E/te hidden "arbitrary"); f32 VMEM accumulator.
# ---------------------------------------------------------------------------

def _mlp_kernel_rows(x_ref, w1_ref, b1_ref, w2_ref, b2_ref, o_ref, acc_ref):
    e = pl.program_id(1)

    @pl.when(e == 0)
    def _():
        acc_ref[...] = jnp.zeros_like(acc_ref)

    # fc1 slice: (tm, D) @ (D, te) + b1[e-tile]   (no activation in forward())
    h = jnp.dot(x_ref[...], w1_ref[...],
                preferred_element_type=jnp.float32) + b1_ref[...]
    # fc2 partial: (tm, te) @ (te, D), accumulated over the hidden dim
    acc_ref[...] += jnp.dot(h.astype(w2_ref.dtype), w2_ref[...],
                            preferred_element_type=jnp.float32)

    @pl.when(e == pl.num_programs(1) - 1)
    def _():
        o_ref[...] = (acc_ref[...] + b2_ref[...]).astype(o_ref.dtype)


def _make_call_rows(M, D, E, tm, te):
    n_e = E // te
    w_bufs = 1 if n_e == 1 else 2
    est = 2 * (tm * D * 2)                                # x tiles (bf16)
    est += w_bufs * (D * te * 2 + te * 4 + te * D * 2)    # W1 / b1 / W2 tiles
    est += D * 4                                          # b2
    est += 2 * (tm * D * 4) + tm * D * 4                  # out tiles + acc scratch
    est += tm * te * 4                                    # h intermediate
    return pl.pallas_call(
        _mlp_kernel_rows,
        out_shape=jax.ShapeDtypeStruct((M, D), jnp.float32),
        grid_spec=pltpu.PrefetchScalarGridSpec(
            num_scalar_prefetch=0,
            grid=(M // tm, n_e),
            in_specs=[
                _spec((tm, D), lambda i, e: (i, 0)),                               # x
                _spec((D, te), lambda i, e: (0, e), single_buffer=(n_e == 1)),     # W1
                _spec((1, te), lambda i, e: (0, e), single_buffer=(n_e == 1)),     # b1
                _spec((te, D), lambda i, e: (e, 0), single_buffer=(n_e == 1)),     # W2
                _spec((1, D), lambda i, e: (0, 0), single_buffer=True),            # b2
            ],
            out_specs=pl.BlockSpec((tm, D), lambda i, e: (i, 0)),
            scratch_shapes=[pltpu.VMEM((tm, D), jnp.float32)],
        ),
        compiler_params=pltpu.CompilerParams(
            dimension_semantics=("parallel", "arbitrary"),
            vmem_limit_bytes=_vmem_limit(est),
        ),
    )


# ---------------------------------------------------------------------------
# wrapper + references
# ---------------------------------------------------------------------------

def mlp_forward(x, w1, b1, w2, b2, *, row_tile=None, e_tile=None):
    """x: (..., D) -> (..., D);  Linear(D,E) -> Linear(E,D), no activation."""
    *lead, D = x.shape
    M = 1
    for s in lead:
        M *= int(s)
    E = w1.shape[1]
    ncores = _num_tensorcores()

    x2 = x.reshape(M, D).astype(jnp.bfloat16)
    w1b = w1.astype(jnp.bfloat16)
    w2b = w2.astype(jnp.bfloat16)
    b1f = b1.astype(jnp.float32)
    b2f = b2.astype(jnp.float32)

    if D < 128:
        # lane-sparse dim: compute transposed so tokens sit on the lane axis.
        tn = row_tile if row_tile is not None else _pick_lane_tile(M, ncores)
        assert M % tn == 0
        call = _make_call_tokens_on_lanes(M, D, E, tn)
        out = call(x2.T, w1b.T, b1f.reshape(E, 1), w2b.T, b2f.reshape(D, 1)).T
    else:
        tm = row_tile if row_tile is not None else _pick_row_tile(M, ncores)
        te = e_tile if e_tile is not None else _pick_e_tile(E)
        assert M % tm == 0 and E % te == 0
        call = _make_call_rows(M, D, E, tm, te)
        out = call(x2, w1b, b1f.reshape(1, E), w2b, b2f.reshape(1, D))
    return out.reshape(*lead, D)


def ref_forward_f32(x, w1, b1, w2, b2):
    *lead, D = x.shape
    h = x.reshape(-1, D) @ w1 + b1
    y = h @ w2 + b2
    return y.reshape(*lead, D)


def ref_forward_bf16(x, w1, b1, w2, b2):
    # Mirrors the kernel's quantization: bf16 MXU operands, f32 accumulation.
    *lead, D = x.shape
    xb = x.reshape(-1, D).astype(jnp.bfloat16)
    h = jnp.dot(xb, w1.astype(jnp.bfloat16),
                preferred_element_type=jnp.float32) + b1
    y = jnp.dot(h.astype(jnp.bfloat16), w2.astype(jnp.bfloat16),
                preferred_element_type=jnp.float32) + b2
    return y.reshape(*lead, D)


def _make_params(key, dim, expansion_rate=4.0):
    E = int(dim * expansion_rate)
    k1, k2, k3, k4 = jax.random.split(key, 4)
    w1 = jax.random.normal(k1, (dim, E), jnp.float32) * (dim ** -0.5)
    b1 = jax.random.normal(k2, (E,), jnp.float32) * 0.05
    w2 = jax.random.normal(k3, (E, dim), jnp.float32) * (E ** -0.5)
    b2 = jax.random.normal(k4, (dim,), jnp.float32) * 0.05
    return w1, b1, w2, b2


def _check(out, x, w1, b1, w2, b2):
    err_q = float(jnp.max(jnp.abs(out - ref_forward_bf16(x, w1, b1, w2, b2))))
    err_f = float(jnp.max(jnp.abs(out - ref_forward_f32(x, w1, b1, w2, b2))))
    assert err_q < 1e-2, f"vs bf16-mirror reference: max abs err {err_q}"
    assert err_f < 2.5e-1, f"vs f32 reference: max abs err {err_f}"


if __name__ == "__main__":
    k_x1, k_x2, k_p1, k_p2 = jax.random.split(jax.random.PRNGKey(0), 4)

    # Case 1: dim < 128 -> tokens-on-lanes (transposed, lane-dense) kernel.
    B, N, dim = 2, 64, 32                      # M = 128, E = 128
    x = jax.random.normal(k_x1, (B, N, dim), jnp.float32)
    w1, b1, w2, b2 = _make_params(k_p1, dim)
    out = jax.block_until_ready(mlp_forward(x, w1, b1, w2, b2))
    assert out.shape == (B, N, dim) and out.dtype == jnp.float32
    _check(out, x, w1, b1, w2, b2)

    # Case 2: dim >= 128 -> row-major kernel with E-reduction + accumulator
    # (tiles chosen to exercise both the row split and the reduction axis).
    B2, N2, dim2 = 2, 128, 128                 # M = 256, E = 512
    x2 = jax.random.normal(k_x2, (B2, N2, dim2), jnp.float32)
    w1_2, b1_2, w2_2, b2_2 = _make_params(k_p2, dim2)
    out2 = jax.block_until_ready(
        mlp_forward(x2, w1_2, b1_2, w2_2, b2_2, row_tile=128, e_tile=256))
    assert out2.shape == (B2, N2, dim2)
    _check(out2, x2, w1_2, b1_2, w2_2, b2_2)

    print("KERNEL_OK")
</pallas_src>

<mosaic_0001>
module attributes {stable_mosaic.version = 11 : i64} {
  func.func @_mlp_kernel_tokens_on_lanes(%arg0: i32, %arg1: memref<32x128xbf16, #tpu.memory_space<vmem>>, %arg2: memref<128x32xbf16, #tpu.memory_space<vmem>>, %arg3: memref<128x1xf32, #tpu.memory_space<vmem>>, %arg4: memref<32x128xbf16, #tpu.memory_space<vmem>>, %arg5: memref<32x1xf32, #tpu.memory_space<vmem>>, %arg6: memref<32x128xf32, #tpu.memory_space<vmem>>) attributes {dimension_semantics = [#tpu.dimension_semantics<parallel>], iteration_bounds = array<i64: 1>, scalar_prefetch = 0 : i64, scratch_operands = 0 : i64, tpu.core_type = #tpu.core_type<tc>, window_params = [{transform_indices = @transform_0, window_bounds = array<i64: 32, 128>}, {pipeline_mode = #tpu.pipeline_mode<synchronous>, transform_indices = @transform_1, window_bounds = array<i64: 128, 32>}, {pipeline_mode = #tpu.pipeline_mode<synchronous>, transform_indices = @transform_2, window_bounds = array<i64: 128, 1>}, {pipeline_mode = #tpu.pipeline_mode<synchronous>, transform_indices = @transform_3, window_bounds = array<i64: 32, 128>}, {pipeline_mode = #tpu.pipeline_mode<synchronous>, transform_indices = @transform_4, window_bounds = array<i64: 32, 1>}, {transform_indices = @transform_5, window_bounds = array<i64: 32, 128>}]} {
    %c0 = arith.constant 0 : index
    %c0_0 = arith.constant 0 : index
    %0 = vector.load %arg2[%c0, %c0_0] : memref<128x32xbf16, #tpu.memory_space<vmem>>, vector<128x32xbf16>
    %c0_1 = arith.constant 0 : index
    %c0_2 = arith.constant 0 : index
    %1 = vector.load %arg1[%c0_1, %c0_2] : memref<32x128xbf16, #tpu.memory_space<vmem>>, vector<32x128xbf16>
    %cst = arith.constant dense<0.000000e+00> : vector<128x128xf32>
    %2 = tpu.matmul %0, %1, %cst {dimension_numbers = #tpu.dot_dimension_numbers<[1], [0], [0], [1], [0, 0, 1, 1], [], []>} : vector<128x32xbf16>, vector<32x128xbf16>, vector<128x128xf32> -> vector<128x128xf32>
    %c0_3 = arith.constant 0 : index
    %c0_4 = arith.constant 0 : index
    %3 = vector.load %arg3[%c0_3, %c0_4] : memref<128x1xf32, #tpu.memory_space<vmem>>, vector<128x1xf32>
    %4 = vector.broadcast %3 : vector<128x1xf32> to vector<128x128xf32>
    %5 = arith.addf %2, %4 : vector<128x128xf32>
    %c0_5 = arith.constant 0 : index
    %c0_6 = arith.constant 0 : index
    %6 = vector.load %arg4[%c0_5, %c0_6] : memref<32x128xbf16, #tpu.memory_space<vmem>>, vector<32x128xbf16>
    %7 = arith.truncf %5 : vector<128x128xf32> to vector<128x128xbf16>
    %cst_7 = arith.constant dense<0.000000e+00> : vector<32x128xf32>
    %8 = tpu.matmul %6, %7, %cst_7 {dimension_numbers = #tpu.dot_dimension_numbers<[1], [0], [0], [1], [0, 0, 1, 1], [], []>} : vector<32x128xbf16>, vector<128x128xbf16>, vector<32x128xf32> -> vector<32x128xf32>
    %c0_8 = arith.constant 0 : index
    %c0_9 = arith.constant 0 : index
    %9 = vector.load %arg5[%c0_8, %c0_9] : memref<32x1xf32, #tpu.memory_space<vmem>>, vector<32x1xf32>
    %10 = vector.broadcast %9 : vector<32x1xf32> to vector<32x128xf32>
    %11 = arith.addf %8, %10 : vector<32x128xf32>
    %c0_10 = arith.constant 0 : index
    %c0_11 = arith.constant 0 : index
    %12 = vector.load %arg6[%c0_10, %c0_11] : memref<32x128xf32, #tpu.memory_space<vmem>>, vector<32x128xf32>
    tpu.vector_store %arg6[%c0_10, %c0_11], %11 {strides = array<i32>} : memref<32x128xf32, #tpu.memory_space<vmem>>, vector<32x128xf32>,
    return
  }
  func.func @transform_0(%arg0: i32) -> (i32, i32) {
    %c0_i32 = arith.constant 0 : i32
    %c0_i32_0 = arith.constant 0 : i32
    return %c0_i32, %arg0 : i32, i32
  }
  func.func @transform_1(%arg0: i32) -> (i32, i32) {
    %c0_i32 = arith.constant 0 : i32
    %c0_i32_0 = arith.constant 0 : i32
    %c0_i32_1 = arith.constant 0 : i32
    return %c0_i32, %c0_i32_0 : i32, i32
  }
  func.func @transform_2(%arg0: i32) -> (i32, i32) {
    %c0_i32 = arith.constant 0 : i32
    %c0_i32_0 = arith.constant 0 : i32
    %c0_i32_1 = arith.constant 0 : i32
    return %c0_i32, %c0_i32_0 : i32, i32
  }
  func.func @transform_3(%arg0: i32) -> (i32, i32) {
    %c0_i32 = arith.constant 0 : i32
    %c0_i32_0 = arith.constant 0 : i32
    %c0_i32_1 = arith.constant 0 : i32
    return %c0_i32, %c0_i32_0 : i32, i32
  }
  func.func @transform_4(%arg0: i32) -> (i32, i32) {
    %c0_i32 = arith.constant 0 : i32
    %c0_i32_0 = arith.constant 0 : i32
    %c0_i32_1 = arith.constant 0 : i32
    return %c0_i32, %c0_i32_0 : i32, i32
  }
  func.func @transform_5(%arg0: i32) -> (i32, i32) {
    %c0_i32 = arith.constant 0 : i32
    %c0_i32_0 = arith.constant 0 : i32
    return %c0_i32, %arg0 : i32, i32
  }
}

</mosaic_0001>

<bundles_post_ra>
// kernel: tpu_custom_call.1
= control target key start
LH: loop header
LB: loop body
LE: loop exit
PB: predicated region body
PF: predicated region fallthrough
CT: control target
= control target key end

     0   :  { %vm190_vm0 = vcmask 261120   ;;  %v549_v3 = vmov 0   ;;  %s693_s0 = inlined_call_operand.vmem [shape: bf16[32,128], index: 0, kind: input, shape index: {}]   ;;  %s694_s1 = inlined_call_operand.vmem [shape: bf16[128,32], index: 1, kind: input, shape index: {}]   ;;  %s695_s2 = inlined_call_operand.vmem [shape: f32[128,1], index: 2, kind: input, shape index: {}]   ;;  %s696_s3 = inlined_call_operand.vmem [shape: bf16[32,128], index: 3, kind: input, shape index: {}]   ;;  %s697_s4 = inlined_call_operand.vmem [shape: f32[32,1], index: 4, kind: input, shape index: {}]   ;;  %s698_s5 = inlined_call_operand.hbm [shape: f32[32,128], index: 5, kind: output, shape index: {}]  }
   0x1   :  { %v515_v0 = vld [vmem:[%s693_s0 + $0x8] sm:$0xff]   ;;  %v516_v1 = vld [vmem:[%s693_s0] sm:$0xff]   ;;  %513 = vset.pattern.permute.xlu0 %v549_v3  ;;  %514 = vset.pattern.permute.xlu1 %v549_v3  ;;  %v519_v5 = vld [vmem:[%s694_s1 + $0x10] sm:$0xff]  }
   0x2   :  { %469 = vmatprep.subr.bf16.mxu0 %v515_v0  ;;  %v517_v2 = vld [vmem:[%s694_s1] sm:$0xff]   ;;  %v518_v4 = vld [vmem:[%s694_s1 + $0x8] sm:$0xff]   ;;  %v56_v6 = vld [vmem:[%s695_s2 + $0x70] sm:$0xff] }
   0x3   :  { %470 = vmatpush3.bf16.msra.mxu0 %v515_v0  ;;  %473 = vmatprep.mubr.msk.bf16.mxu0 %vm190_vm0, %v517_v2  ;;  %v54_v7 = vld [vmem:[%s695_s2 + $0x60] sm:$0xff]  ;;  %v57_v8 = vld [vmem:[%s695_s2 + $0x78] sm:$0xff]  ;;  %v55_v9 = vld [vmem:[%s695_s2 + $0x68] sm:$0xff] }
   0x4   :  { %471 = vmatprep.subr.bf16.mxu0 %v516_v1  ;;  %130 = vperm.xlu0 %513, %v56_v6   ;;  %v520_v10 = vld [vmem:[%s694_s1 + $0x18] sm:$0xff]   ;;  %v521_v11 = vld [vmem:[%s694_s1 + $0x20] sm:$0xff]   ;;  %v52_v12 = vld [vmem:[%s695_s2 + $0x50] sm:$0xff] }
   0x5   :  { %120 = vperm.xlu1 %514, %v54_v7   ;;  %v53_v13 = vld [vmem:[%s695_s2 + $0x58] sm:$0xff] }
   0x7   :  { %472 = vmatpush3.bf16.msra.mxu0 %v516_v1 }
   0x8   :  { %135 = vperm.xlu0 %513, %v57_v8  }
   0x9   :  { %125 = vperm.xlu1 %514, %v55_v9  }
   0xa   :  { %474 = vmatmul.mubr.msk.bf16.vlgmr.msra.gmra.mxu0 %vm190_vm0, %v518_v4 }
   0xb   :  { %477 = vmatprep.mubr.msk.bf16.mxu0 %vm190_vm0, %v519_v5 }
  0x12   :  { %478 = vmatmul.mubr.msk.bf16.gmra.mxu0 %vm190_vm0, %v520_v10 }
  0x13   :  { %10 = vsyncpa [#allocation3], 0  ;;  %481 = vmatprep.mubr.msk.bf16.mxu0 %vm190_vm0, %v521_v11  ;;  %110 = vperm.xlu0 %513, %v52_v12   ;;  %v50_v14 = vld [vmem:[%s695_s2 + $0x40] sm:$0xff]  ;;  %v51_v15 = vld [vmem:[%s695_s2 + $0x48] sm:$0xff]  ;;  %s550_s27 = smov [#allocation2]  }
  0x14   :  { %115 = vperm.xlu1 %514, %v53_v13   ;;  %v522_v16 = vld [vmem:[%s694_s1 + $0x28] sm:$0xff]   ;;  %v523_v17 = vld [vmem:[%s694_s1 + $0x30] sm:$0xff]   ;;  %v49_v19 = vld [vmem:[%s695_s2 + $0x38] sm:$0xff]  ;;  %s418_s0 = sshll.u32 %s550_s27, 4  ;;  %s419_s0 = int_to_ptr.vmem [resolvable:$true] %s418_s0 }
  0x15   :  { %v48_v18 = vld [vmem:[%s695_s2 + $0x30] sm:$0xff]  ;;  %v46_v20 = vld [vmem:[%s695_s2 + $0x20] sm:$0xff]  ;;  %v47_v21 = vld [vmem:[%s695_s2 + $0x28] sm:$0xff]  ;;  %p532_p1 = scmp.lt.s32.totalorder %s419_s0, %s419_s0 }
  0x16   :  { %v524_v22 = vld [vmem:[%s694_s1 + $0x38] sm:$0xff]   ;;  %v44_v23 = vld [vmem:[%s695_s2 + $0x10] sm:$0xff]  ;;  %v42_v25 = vld [vmem:[%s695_s2] sm:$0xff] }
  0x17   :  { %100 = vperm.xlu0 %513, %v50_v14   ;;  %v45_v24 = vld [vmem:[%s695_s2 + $0x18] sm:$0xff]  ;;  %v43_v26 = vld [vmem:[%s695_s2 + $0x8] sm:$0xff]  ;;  %v324_v27 = vld [vmem:[%s697_s4] sm:$0xff] }
  0x18   :  { %105 = vperm.xlu1 %514, %v51_v15   ;;  %v325_v28 = vld [vmem:[%s697_s4 + $0x8] sm:$0xff]  ;;  %v326_v29 = vld [vmem:[%s697_s4 + $0x10] sm:$0xff]  ;;  %v327_v30 = vld [vmem:[%s697_s4 + $0x18] sm:$0xff] }
  0x19   :  { %v525_v31 = vld [vmem:[%s696_s3] sm:$0xff]  }
  0x1a   :  { %482 = vmatmul.mubr.msk.bf16.gmra.mxu0 %vm190_vm0, %v522_v16  ;;  %505 = vmatprep.mubr.bf16.mxu1 %v525_v31 }
  0x1b   :  { %485 = vmatprep.mubr.msk.bf16.mxu0 %vm190_vm0, %v523_v17  ;;  %90 = vperm.xlu0 %513, %v48_v18  }
  0x1c   :  { %95 = vperm.xlu1 %514, %v49_v19  }
  0x1f   :  { %80 = vperm.xlu0 %513, %v46_v20  }
  0x20   :  { %85 = vperm.xlu1 %514, %v47_v21  }
  0x22   :  { %486 = vmatmul.mubr.msk.bf16.gmra.mxu0 %vm190_vm0, %v524_v22 }
  0x23   :  { %70 = vperm.xlu0 %513, %v44_v23  }
  0x24   :  { %75 = vperm.xlu1 %514, %v45_v24   ;;  %v526_v24 = vld [vmem:[%s696_s3 + $0x8] sm:$0xff]   ;;  %s527_s3 = scalar_lea.vmem %s419_s0, 512 }
  0x25   :  { %p528_p0 = scmp.ne.s32.totalorder %s419_s0, %s527_s3  ;;  %p533_p2 = scmp.lt.s32.totalorder %s527_s3, %s527_s3 }
  0x27   :  { %60 = vperm.xlu0 %513, %v42_v25   ;;  %p534_p3 = por %p533_p2, %p532_p1 }
  0x28   :  { %65 = vperm.xlu1 %514, %v43_v26  }
  0x29   :  { %p535_p4 = pnand %p534_p3, %p528_p0 }
  0x2b   :  { %330 = vperm.xlu0 %513, %v324_v27  }
  0x2c   :  { %335 = vperm.xlu1 %514, %v325_v28  }
  0x2f   :  { %340 = vperm.xlu0 %513, %v326_v29  }
  0x30   :  { %345 = vperm.xlu1 %514, %v327_v30  }
  0x7f   :  { %v131_v38 = vpop.permute.xlu0 %130 }
  0x80   :  { %v121_v36 = vpop.permute.xlu1 %120 }
  0x83   :  { %v136_v43 = vpop.permute.xlu0 %135 }
  0x84   :  { %v126_v41 = vpop.permute.xlu1 %125 }
  0x8e   :  { %v111_v48 = vpop.permute.xlu0 %110 }
  0x8f   :  { %v116_v46 = vpop.permute.xlu1 %115 }
  0x92   :  { %v101_v53 = vpop.permute.xlu0 %100 }
  0x93   :  { %v106_v51 = vpop.permute.xlu1 %105 }
  0x96   :  { %v91_v0 = vpop.permute.xlu0 %90 }
  0x97   :  { %v96_v61 = vpop.permute.xlu1 %95 }
  0x9a   :  { %v81_v6 = vpop.permute.xlu0 %80 }
  0x9b   :  { %v86_v4 = vpop.permute.xlu1 %85 }
  0x9e   :  { %v71_v13 = vpop.permute.xlu0 %70 }
  0x9f   :  { %v76_v10 = vpop.permute.xlu1 %75 }
  0xa2   :  { %v61_v19 = vpop.permute.xlu0 %60 }
  0xa3   :  { %v66_v17 = vpop.permute.xlu1 %65 }
  0xa6   :  { %v331_v25 = vpop.permute.xlu0 %330 }
  0xa7   :  { %v336_v26 = vpop.permute.xlu1 %335 }
  0xaa   :  { %v341_v27 = vpop.permute.xlu0 %340 }
  0xca   :  { %v475_v32 = vpop.f32.mrf.mxu0 }
  0xcb   :  { %v258_v18 = vadd.f32 %v475_v32, %v71_v13  ;;  %v346_v32 = vpop.permute.xlu1 %345 }
  0xcc   :  { %v684_v33 = vpop.f32.mrf.mxu0 }
  0xcd   :  { %v250_v22 = vadd.f32 %v684_v33, %v61_v19 }
  0xce   :  { %v476_v34 = vpop.f32.mrf.mxu0 }
  0xcf   :  { %v261_v15 = vadd.f32 %v476_v34, %v76_v10 }
  0xd0   :  { %v252_v35 = vpop.f32.mrf.mxu0 }
  0xd1   :  { %v317_v20 = vpack.c.bf16 %v261_v15, %v258_v18  ;;  %v253_v21 = vadd.f32 %v252_v35, %v66_v17 }
  0xd2   :  { %v479_v37 = vpop.f32.mrf.mxu0 }
  0xd3   :  { %v274_v9 = vadd.f32 %v479_v37, %v91_v0  ;;  %v316_v23 = vpack.c.bf16 %v253_v21, %v250_v22 }
  0xd4   :  { %v265_v39 = vpop.f32.mrf.mxu0 }
  0xd5   :  { %v266_v14 = vadd.f32 %v265_v39, %v81_v6 }
  0xd6   :  { %v480_v40 = vpop.f32.mrf.mxu0 }
  0xd7   :  { %v277_v7 = vadd.f32 %v480_v40, %v96_v61 }
  0xd8   :  { %v268_v42 = vpop.f32.mrf.mxu0 }
  0xd9   :  { %v319_v11 = vpack.c.bf16 %v277_v7, %v274_v9  ;;  %v269_v12 = vadd.f32 %v268_v42, %v86_v4 }
  0xda   :  { %v483_v44 = vpop.f32.mrf.mxu0 }
  0xdb   :  { %v290_v1 = vadd.f32 %v483_v44, %v111_v48  ;;  %v318_v16 = vpack.c.bf16 %v269_v12, %v266_v14 }
  0xdc   :  { %v281_v45 = vpop.f32.mrf.mxu0 }
  0xdd   :  { %v282_v5 = vadd.f32 %v281_v45, %v101_v53 }
  0xde   :  { %v484_v47 = vpop.f32.mrf.mxu0 }
  0xdf   :  { %v293_v62 = vadd.f32 %v484_v47, %v116_v46 }
  0xe0   :  { %v284_v49 = vpop.f32.mrf.mxu0 }
  0xe1   :  { %v321_v2 = vpack.c.bf16 %v293_v62, %v290_v1  ;;  %v285_v3 = vadd.f32 %v284_v49, %v106_v51 }
  0xe2   :  { %v487_v50 = vpop.f32.mrf.mxu0 }
  0xe3   :  { %v306_v55 = vadd.f32 %v487_v50, %v131_v38  ;;  %v320_v8 = vpack.c.bf16 %v285_v3, %v282_v5 }
  0xe4   :  { %v297_v52 = vpop.f32.mrf.mxu0 }
  0xe5   :  { %v298_v58 = vadd.f32 %v297_v52, %v121_v36 }
  0xe6   :  { %v488_v54 = vpop.f32.mrf.mxu0 }
  0xe7   :  { %v309_v56 = vadd.f32 %v488_v54, %v136_v43 }
  0xe8   :  { %v300_v57 = vpop.f32.mrf.mxu0 }
  0xe9   :  { %v301_v59 = vadd.f32 %v300_v57, %v126_v41  ;;  %v323_v60 = vpack.c.bf16 %v309_v56, %v306_v55 }
  0xeb   :  { %v322_v63 = vpack.c.bf16 %v301_v59, %v298_v58  ;;  %489 = vmatprep.subr.bf16.mxu1 %v323_v60 }
  0xec   :  { %490 = vmatpush3.bf16.msra.mxu1 %v323_v60 }
  0xed   :  { %491 = vmatprep.subr.bf16.mxu1 %v322_v63 }
  0xf0   :  { %492 = vmatpush3.bf16.msra.mxu1 %v322_v63 }
  0xf1   :  { %493 = vmatprep.subr.bf16.mxu1 %v321_v2 }
  0xf4   :  { %494 = vmatpush3.bf16.msra.mxu1 %v321_v2 }
  0xf5   :  { %495 = vmatprep.subr.bf16.mxu1 %v320_v8 }
  0xf8   :  { %496 = vmatpush3.bf16.msra.mxu1 %v320_v8 }
  0xf9   :  { %497 = vmatprep.subr.bf16.mxu1 %v319_v11 }
  0xfc   :  { %498 = vmatpush3.bf16.msra.mxu1 %v319_v11 }
  0xfd   :  { %499 = vmatprep.subr.bf16.mxu1 %v318_v16 }
 0x100   :  { %500 = vmatpush3.bf16.msra.mxu1 %v318_v16 }
 0x101   :  { %501 = vmatprep.subr.bf16.mxu1 %v317_v20 }
 0x104   :  { %502 = vmatpush3.bf16.msra.mxu1 %v317_v20 }
 0x105   :  { %503 = vmatprep.subr.bf16.mxu1 %v316_v23 }
 0x108   :  { %504 = vmatpush3.bf16.msra.mxu1 %v316_v23 }
 0x10b   :  { %506 = vmatmul.mubr.bf16.vlgmr.msra.gmra.mxu1 %v526_v24 }
 0x1cb   :  { %v507_v28 = vpop.f32.mrf.mxu1 }
 0x1cc   :  { %v403_v29 = vadd.f32 %v507_v28, %v341_v27 }
 0x1cd   :  { %v394_v30 = vpop.f32.mrf.mxu1 }
 0x1ce   :  { %411 = vst [vmem:[#allocation2 + $0x10] sm:$0xff] %v403_v29  ;;  %v395_v31 = vadd.f32 %v394_v30, %v331_v25 }
 0x1cf   :  { %v508_v33 = vpop.f32.mrf.mxu1 }
 0x1d0   :  { %409 = vst [vmem:[#allocation2] sm:$0xff] %v395_v31  ;;  %v406_v34 = vadd.f32 %v508_v33, %v346_v32 }
 0x1d1   :  { %v397_v35 = vpop.f32.mrf.mxu1 }
 0x1d2   :  { %412 = vst [vmem:[#allocation2 + $0x18] sm:$0xff] %v406_v34  ;;  %v398_v36 = vadd.f32 %v397_v35, %v336_v26 }
 0x1d4   :  { %410 = vst [vmem:[#allocation2 + $0x8] sm:$0xff] %v398_v36 }
 0x1d5   :  { %538 = shalt.err (!%p535_p4)
}
 0x1d6   :  { %s551_s28 = smov 128   ;;  %s552_s29 = smov 8  }
 0x1d7   :  { %424 = dma.vmem_to_hbm [thread:$0]  %s419_s0, 512, %s698_s5, [#allocation3], %s551_s28, %s551_s28, %s552_s29  }
 0x1d8   :  { %547 = dma.done.wait [#allocation3], 512  }
 0x1d9   :  { %548 = vsyncadd [#allocation3], 4294966784 }
 0x1da   :  { %428 = vsyncpa [#allocation3], 1 }

</bundles_post_ra>
